<compile_context>
chip_gen: v7x
topology: tpu7x:2x2x1
jax: 0.10.0
libtpu: 0.0.40
codegen_flags: <defaults>
</compile_context>

<pallas_src>
import functools

import jax
import jax.numpy as jnp
from jax.experimental import pallas as pl
from jax.experimental.pallas import tpu as pltpu

# FakeDynamicQuant(reduce_range=True, dtype=quint8, bits=8) constants.
BITS = 8
QMIN, QMAX = 0.0, float(2 ** (BITS - 1))          # module clamp range for fake_quantize: [0, 128]
OBS_QMIN, OBS_QMAX = 0.0, 127.0                   # MinMaxObserver(quint8, reduce_range=True) range
EPS = float(jnp.finfo(jnp.float32).eps)

LANES = 128
TILE_ROWS = 2048                                  # (2048, 128) f32 = 1 MiB per block
SMALL_ELEMS = 1 << 20                             # <= 4 MiB f32 -> single fused whole-array kernel


def _qparams(mn, mx):
    """MinMaxObserver(quint8, per_tensor_affine, reduce_range=True).calculate_qparams()."""
    mn = jnp.minimum(mn, 0.0)
    mx = jnp.maximum(mx, 0.0)
    scale = jnp.maximum((mx - mn) / (OBS_QMAX - OBS_QMIN), EPS)
    zp = jnp.clip(OBS_QMIN - jnp.round(mn / scale), OBS_QMIN, OBS_QMAX)
    return scale, zp


def _fake_quantize(x, scale, zp, inv_scale):
    """torch.fake_quantize_per_tensor_affine(x, scale, zp, QMIN, QMAX) (inv_scale multiply)."""
    q = jnp.clip(jnp.round(x * inv_scale + zp), QMIN, QMAX)
    return (q - zp) * scale


# --------------- Path A: whole tensor fits in VMEM -> single fused kernel ---------------


def _fused_kernel(x_ref, o_ref):
    x = x_ref[...]
    mn = jnp.min(x, keepdims=True)
    mx = jnp.max(x, keepdims=True)
    scale, zp = _qparams(mn, mx)
    o_ref[...] = _fake_quantize(x, scale, zp, 1.0 / scale)


def _small_path(x2):
    return pl.pallas_call(
        _fused_kernel,
        out_shape=jax.ShapeDtypeStruct(x2.shape, jnp.float32),
    )(x2)


# --------------- Path B: large tensors -> two-pass tiled pipeline -----------------------


def _minmax_qparams_kernel(x_ref, scale_ref, zp_ref, inv_ref, min_sc, max_sc,
                           *, valid_rows):
    step = pl.program_id(0)

    @pl.when(step == 0)
    def _init():
        # 0 is a neutral init: the observer clamps min_val<=0 and max_val>=0 anyway.
        min_sc[...] = jnp.zeros_like(min_sc)
        max_sc[...] = jnp.zeros_like(max_sc)

    x = x_ref[...]
    if valid_rows % TILE_ROWS != 0:
        # Ragged last block: rows at or past `valid_rows` hold unspecified data -> mask to 0
        # (neutral, see above).  `valid_rows` is static, so this code is only emitted if needed.
        row = step * TILE_ROWS + jax.lax.broadcasted_iota(jnp.int32, x.shape, 0)
        x = jnp.where(row < valid_rows, x, 0.0)

    # Per-lane partial min/max (sublane reduce: mostly elementwise VPU work, hidden under DMA);
    # the expensive cross-lane reduce happens once, in the final step below.
    min_sc[...] = jnp.minimum(min_sc[...], jnp.min(x, axis=0, keepdims=True))
    max_sc[...] = jnp.maximum(max_sc[...], jnp.max(x, axis=0, keepdims=True))

    @pl.when(step == pl.num_programs(0) - 1)
    def _finalize():
        scale, zp = _qparams(jnp.min(min_sc[...], keepdims=True),
                             jnp.max(max_sc[...], keepdims=True))
        scale_ref[...] = scale
        zp_ref[...] = zp
        inv_ref[...] = 1.0 / scale


def _quant_kernel(scale_ref, zp_ref, inv_ref, x_ref, o_ref):
    # Hot loop: one mul, one add, round, clip, sub, mul — no divides, no qparam recompute.
    o_ref[...] = _fake_quantize(x_ref[...], scale_ref[...], zp_ref[...], inv_ref[...])


def _tiled_path(x):
    orig_shape = x.shape
    flat = x.reshape(-1)
    n = flat.shape[0]
    pad = (-n) % LANES
    if pad:
        # Zero padding (< 128 elements) is exactly neutral for the observer; padded
        # outputs are sliced off below.
        flat = jnp.pad(flat, (0, pad))
    x2d = flat.reshape(-1, LANES)
    rows = x2d.shape[0]
    n_tiles = pl.cdiv(rows, TILE_ROWS)

    scalar_spec = pl.BlockSpec((1, 1), lambda i: (0, 0))
    tile_spec = pl.BlockSpec((TILE_ROWS, LANES), lambda i: (i, 0))
    scalar_shape = jax.ShapeDtypeStruct((1, 1), jnp.float32)

    # Pass 1: global min/max reduction; qparams emitted once in the final step.
    scale, zp, inv_scale = pl.pallas_call(
        functools.partial(_minmax_qparams_kernel, valid_rows=rows),
        out_shape=(scalar_shape, scalar_shape, scalar_shape),
        grid=(n_tiles,),
        in_specs=[tile_spec],
        out_specs=(scalar_spec, scalar_spec, scalar_spec),
        scratch_shapes=[pltpu.VMEM((1, LANES), jnp.float32),
                        pltpu.VMEM((1, LANES), jnp.float32)],
        compiler_params=pltpu.CompilerParams(dimension_semantics=("arbitrary",)),
    )(x2d)

    # Pass 2: elementwise fake quantization (parallel across cores).
    y2d = pl.pallas_call(
        _quant_kernel,
        out_shape=jax.ShapeDtypeStruct(x2d.shape, jnp.float32),
        grid=(n_tiles,),
        in_specs=[scalar_spec, scalar_spec, scalar_spec, tile_spec],
        out_specs=tile_spec,
        compiler_params=pltpu.CompilerParams(dimension_semantics=("parallel",)),
    )(scale, zp, inv_scale, x2d)

    if pad:
        return y2d.reshape(-1)[:n].reshape(orig_shape)
    return y2d.reshape(orig_shape)


# --------------- Public wrapper ----------------------------------------------------------


def fake_dynamic_quant(x):
    """Pallas TPU implementation of FakeDynamicQuant.forward (module defaults), f32 inputs."""
    if x.dtype != jnp.float32:
        return x                                  # module is a no-op for non-float32 inputs
    n = x.size
    if n == 0:
        return x
    if n <= SMALL_ELEMS:
        # Whole tensor fits comfortably in VMEM: one fused launch, one read + one write pass.
        if n % LANES == 0:
            x2 = x.reshape(-1, LANES)             # lane-dense layout
        elif x.ndim >= 2:
            x2 = x.reshape(-1, x.shape[-1])
        else:
            x2 = x.reshape(1, -1)
        return _small_path(x2).reshape(x.shape)
    return _tiled_path(x)


def _reference(x):
    """Pure-JAX reference of the same forward (mirrors torch's inv_scale-multiply kernel)."""
    scale, zp = _qparams(jnp.min(x), jnp.max(x))
    return _fake_quantize(x, scale, zp, 1.0 / scale)


if __name__ == "__main__":
    key = jax.random.PRNGKey(0)
    k1, k2, k3 = jax.random.split(key, 3)

    # NCHW conv-style activation (exercises the fused single-block path).
    x_small = jax.random.normal(k1, (2, 4, 16, 16), dtype=jnp.float32) * 3.0 - 0.5
    y_small = fake_dynamic_quant(x_small)
    jax.block_until_ready(y_small)
    assert y_small.shape == x_small.shape and y_small.dtype == jnp.float32
    assert jnp.allclose(y_small, _reference(x_small), atol=1e-5, rtol=1e-5)

    # Exercise the tiled two-pass path with a ragged size (lane pad + in-kernel row mask).
    x_ragged = jax.random.normal(k2, (3, 5, 40, 33), dtype=jnp.float32) * 2.0 + 0.3
    y_ragged = _tiled_path(x_ragged)
    jax.block_until_ready(y_ragged)
    assert y_ragged.shape == x_ragged.shape
    assert jnp.allclose(y_ragged, _reference(x_ragged), atol=1e-5, rtol=1e-5)

    # Exercise the tiled path with multiple (2048, 128) tiles (multi-step accumulation).
    x_multi = jax.random.normal(k3, (4, 512, 256), dtype=jnp.float32) * 1.5
    y_multi = _tiled_path(x_multi)
    jax.block_until_ready(y_multi)
    assert jnp.allclose(y_multi, _reference(x_multi), atol=1e-5, rtol=1e-5)

    print("KERNEL_OK")
</pallas_src>

<mosaic_0001>
module attributes {stable_mosaic.version = 11 : i64} {
  func.func @_fused_kernel(%arg0: memref<16x128xf32, #tpu.memory_space<vmem>>, %arg1: memref<16x128xf32, #tpu.memory_space<vmem>>) attributes {dimension_semantics = [], scalar_prefetch = 0 : i64, scratch_operands = 0 : i64, tpu.core_type = #tpu.core_type<tc>} {
    %c0 = arith.constant 0 : index
    %c0_0 = arith.constant 0 : index
    %0 = vector.load %arg0[%c0, %c0_0] : memref<16x128xf32, #tpu.memory_space<vmem>>, vector<16x128xf32>
    %1 = vector.shape_cast %0 : vector<16x128xf32> to vector<1x16x128xf32>
    %cst = arith.constant dense<0x7F800000> : vector<1xf32>
    %2 = vector.multi_reduction <minimumf>, %1, %cst [1, 2] : vector<1x16x128xf32> to vector<1xf32>
    %3 = vector.shape_cast %2 : vector<1xf32> to vector<1x1x1xf32>
    %4 = vector.extract %3[0, 0, 0] : f32 from vector<1x1x1xf32>
    %5 = vector.broadcast %4 : f32 to vector<1x1xf32>
    %6 = vector.shape_cast %0 : vector<16x128xf32> to vector<1x16x128xf32>
    %cst_1 = arith.constant dense<0xFF800000> : vector<1xf32>
    %7 = vector.multi_reduction <maximumf>, %6, %cst_1 [1, 2] : vector<1x16x128xf32> to vector<1xf32>
    %8 = vector.shape_cast %7 : vector<1xf32> to vector<1x1x1xf32>
    %9 = vector.extract %8[0, 0, 0] : f32 from vector<1x1x1xf32>
    %10 = vector.broadcast %9 : f32 to vector<1x1xf32>
    %cst_2 = arith.constant 0.000000e+00 : f32
    %11 = vector.broadcast %cst_2 : f32 to vector<1x1xf32>
    %12 = arith.minimumf %5, %11 : vector<1x1xf32>
    %cst_3 = arith.constant 0.000000e+00 : f32
    %13 = vector.broadcast %cst_3 : f32 to vector<1x1xf32>
    %14 = arith.maximumf %10, %13 : vector<1x1xf32>
    %15 = arith.subf %14, %12 : vector<1x1xf32>
    %cst_4 = arith.constant 1.270000e+02 : f32
    %16 = vector.broadcast %cst_4 : f32 to vector<1x1xf32>
    %17 = arith.divf %15, %16 : vector<1x1xf32>
    %cst_5 = arith.constant 1.1920929E-7 : f32
    %18 = vector.broadcast %cst_5 : f32 to vector<1x1xf32>
    %19 = arith.maximumf %17, %18 : vector<1x1xf32>
    %20 = arith.divf %12, %19 : vector<1x1xf32>
    %21 = math.roundeven %20 : vector<1x1xf32>
    %cst_6 = arith.constant 0.000000e+00 : f32
    %22 = vector.broadcast %cst_6 : f32 to vector<1x1xf32>
    %23 = arith.subf %22, %21 : vector<1x1xf32>
    %cst_7 = arith.constant 0.000000e+00 : f32
    %cst_8 = arith.constant 1.270000e+02 : f32
    %24 = vector.broadcast %cst_7 : f32 to vector<1x1xf32>
    %25 = arith.maximumf %24, %23 : vector<1x1xf32>
    %26 = vector.broadcast %cst_8 : f32 to vector<1x1xf32>
    %27 = arith.minimumf %26, %25 : vector<1x1xf32>
    %cst_9 = arith.constant 1.000000e+00 : f32
    %28 = vector.broadcast %cst_9 : f32 to vector<1x1xf32>
    %29 = arith.divf %28, %19 : vector<1x1xf32>
    %30 = vector.broadcast %29 : vector<1x1xf32> to vector<16x128xf32>
    %31 = arith.mulf %0, %30 : vector<16x128xf32>
    %32 = vector.broadcast %27 : vector<1x1xf32> to vector<16x128xf32>
    %33 = arith.addf %31, %32 : vector<16x128xf32>
    %34 = math.roundeven %33 : vector<16x128xf32>
    %cst_10 = arith.constant 0.000000e+00 : f32
    %cst_11 = arith.constant 1.280000e+02 : f32
    %35 = vector.broadcast %cst_10 : f32 to vector<16x128xf32>
    %36 = arith.maximumf %35, %34 : vector<16x128xf32>
    %37 = vector.broadcast %cst_11 : f32 to vector<16x128xf32>
    %38 = arith.minimumf %37, %36 : vector<16x128xf32>
    %39 = vector.broadcast %27 : vector<1x1xf32> to vector<16x128xf32>
    %40 = arith.subf %38, %39 : vector<16x128xf32>
    %41 = vector.broadcast %19 : vector<1x1xf32> to vector<16x128xf32>
    %42 = arith.mulf %40, %41 : vector<16x128xf32>
    %c0_12 = arith.constant 0 : index
    %c0_13 = arith.constant 0 : index
    %43 = vector.load %arg1[%c0_12, %c0_13] : memref<16x128xf32, #tpu.memory_space<vmem>>, vector<16x128xf32>
    tpu.vector_store %arg1[%c0_12, %c0_13], %42 {strides = array<i32>} : memref<16x128xf32, #tpu.memory_space<vmem>>, vector<16x128xf32>,
    return
  }
}

</mosaic_0001>

<bundles_post_ra>
// kernel: tpu_custom_call.1
= control target key start
LH: loop header
LB: loop body
LE: loop exit
PB: predicated region body
PF: predicated region fallthrough
CT: control target
= control target key end

     0   :  { %6 = vsyncpa [#allocation3], 0  ;;  %s198_s0 = inlined_call_operand.hbm [shape: f32[16,128], index: 0, kind: input, shape index: {}]   ;;  %s199_s1 = inlined_call_operand.hbm [shape: f32[16,128], index: 1, kind: output, shape index: {}]  }
   0x1   :  { %7 = vsyncpa [#allocation4], 0  ;;  %s154_s6 = smov [#allocation2]   ;;  %s106_s10 = scalar_lea.hbm %s198_s0, 256 }
   0x2   :  { %s13_s7 = sshll.u32 %s154_s6, 4  ;;  %p107_p0 = scmp.ne.s32.totalorder %s198_s0, %s106_s10  ;;  %s14_s7 = int_to_ptr.vmem [resolvable:$true] %s13_s7 }
   0x3   :  { %p110_p1 = scmp.lt.u32.totalorder %s106_s10, %s198_s0 }
   0x5   :  { %p112_p2 = pnand %p110_p1, %p107_p0 }
   0x7   :  { %115 = shalt.err (!%p112_p2)
}
   0x8   :  { %s116_s15 = scalar_lea.vmem %s14_s7, 256  ;;  %p121_p4 = scmp.lt.s32.totalorder %s14_s7, %s14_s7 }
   0x9   :  { %p117_p3 = scmp.ne.s32.totalorder %s14_s7, %s116_s15  ;;  %p122_p5 = scmp.lt.s32.totalorder %s116_s15, %s116_s15 }
   0xb   :  { %p123_p6 = por %p122_p5, %p121_p4 }
   0xd   :  { %p124_p7 = pnand %p123_p6, %p117_p3 }
   0xf   :  { %127 = shalt.err (!%p124_p7)
}
  0x10   :  { %s155_s16 = smov 128   ;;  %s156_s17 = smov 8  }
  0x11   :  { %19 = dma.hbm_to_vmem [thread:$0]  %s198_s0, 256, %s14_s7, [#allocation3], %s155_s16, %s155_s16, %s156_s17  }
  0x12   :  { %150 = dma.done.wait [#allocation3], 256  }
  0x13   :  { %151 = vsyncadd [#allocation3], 4294967040  ;;  %v23_v0 = vld [vmem:[#allocation2] sm:$0xff]  ;;  %v24_v1 = vld [vmem:[#allocation2 + $0x8] sm:$0xff]  ;;  %s157_s21 = smov [#allocation5]  }
  0x14   :  { %v25_v2 = vmin.f32 %v23_v0, %v24_v1  ;;  %v36_v3 = vmax.f32 %v23_v0, %v24_v1  ;;  %s81_s22 = sshll.u32 %s157_s21, 4  ;;  %s82_s22 = int_to_ptr.vmem [resolvable:$true] %s81_s22 }
  0x15   :  { %s128_s23 = scalar_lea.vmem %s82_s22, 256  ;;  %p133_p9 = scmp.lt.s32.totalorder %s82_s22, %s82_s22 }
  0x16   :  { %26 = vmin.xlane.f32.xlu0 %v25_v2  ;;  %p129_p8 = scmp.ne.s32.totalorder %s82_s22, %s128_s23  ;;  %p134_p10 = scmp.lt.s32.totalorder %s128_s23, %s128_s23 }
  0x18   :  { %p135_p11 = por %p134_p10, %p133_p9 }
  0x1a   :  { %37 = vmax.xlane.f32.xlu0 %v36_v3  ;;  %p136_p12 = pnand %p135_p11, %p129_p8 }
  0xa3   :  { %v27_v4 = vpop.xlane.xlu0 %26 }
  0xa4   :  { %v28_v5 = vrot.slane %v27_v4, 4 }
  0xa6   :  { %v29_v6 = vmin.f32 %v27_v4, %v28_v5 }
  0xa7   :  { %v38_v7 = vpop.xlane.xlu0 %37 }
  0xa8   :  { %v30_v8 = vrot.slane %v29_v6, 2  ;;  %v39_v9 = vrot.slane %v38_v7, 4 }
  0xaa   :  { %v40_v10 = vmax.f32 %v38_v7, %v39_v9  ;;  %v31_v11 = vmin.f32 %v29_v6, %v30_v8 }
  0xac   :  { %v41_v12 = vrot.slane %v40_v10, 2  ;;  %v32_v13 = vrot.slane %v31_v11, 1 }
  0xae   :  { %v42_v14 = vmax.f32 %v40_v10, %v41_v12  ;;  %v33_v15 = vmin.f32 %v31_v11, %v32_v13 }
  0xb0   :  { %93 = vpush %v33_v15  ;;  %v43_v16 = vrot.slane %v42_v14, 1 }
  0xb2   :  { %v44_v17 = vmax.f32 %v42_v14, %v43_v16 }
  0xb4   :  { %95 = vpush %v44_v17 }
  0xe1   :  { %s94_s0 = spop %93 }
  0xe2   :  { %v35_v18 = vstv %s94_s0 }
  0xe3   :  { %v47_v20 = vmin.f32 %v35_v18, 0.0 }
  0xe5   :  { %s96_s20 = spop %95 }
  0xe6   :  { %v46_v19 = vstv %s96_s20 }
  0xe7   :  { %v48_v21 = vmax.f32 %v46_v19, 0.0 }
  0xe9   :  { %v49_v22 = vsub.f32 %v48_v21, %v47_v20 }
  0xeb   :  { %v51_v23 = vmul.f32 0.007874016, %v49_v22 }
  0xed   :  { %v52_v24 = vmax.f32 %v51_v23, 1.1920929e-07 }
  0xef   :  { %104 = vrcp.f32 %v52_v24 }
  0xf9   :  { %v105_v25 = vpop.eup %104 }
  0xfa   :  { %v54_v26 = vmul.f32 %v105_v25, %v47_v20  ;;  %v60_v31 = vmul.f32 %v105_v25, %v23_v0  ;;  %v61_v32 = vmul.f32 %v105_v25, %v24_v1 }
  0xfc   :  { %v97_v27 = vround.rtne.f32 %v54_v26 }
  0xfe   :  { %v56_v28 = vsub.f32 0.0, %v97_v27 }
 0x100   :  { %v57_v29 = vmax.f32 %v56_v28, 0.0 }
 0x102   :  { %v58_v30 = vmin.f32 %v57_v29, 127.0 }
 0x104   :  { %v62_v33 = vadd.f32 %v60_v31, %v58_v30  ;;  %v63_v34 = vadd.f32 %v61_v32, %v58_v30 }
 0x106   :  { %v98_v35 = vround.rtne.f32 %v62_v33  ;;  %v99_v36 = vround.rtne.f32 %v63_v34 }
 0x108   :  { %v66_v37 = vmax.f32 %v98_v35, 0.0  ;;  %v67_v38 = vmax.f32 %v99_v36, 0.0 }
 0x10a   :  { %v68_v39 = vmin.f32 %v66_v37, 128.0  ;;  %v69_v40 = vmin.f32 %v67_v38, 128.0 }
 0x10c   :  { %v70_v41 = vsub.f32 %v68_v39, %v58_v30  ;;  %v71_v42 = vsub.f32 %v69_v40, %v58_v30 }
 0x10e   :  { %v72_v43 = vmul.f32 %v70_v41, %v52_v24  ;;  %v73_v44 = vmul.f32 %v71_v42, %v52_v24 }
 0x110   :  { %74 = vst [vmem:[#allocation5] sm:$0xff] %v72_v43  ;;  %75 = vst [vmem:[#allocation5 + $0x8] sm:$0xff] %v73_v44 }
 0x111   :  { %139 = shalt.err (!%p136_p12)
}
 0x112   :  { %s140_s26 = scalar_lea.hbm %s199_s1, 256 }
 0x113   :  { %p141_p13 = scmp.ne.s32.totalorder %s199_s1, %s140_s26  ;;  %p144_p0 = scmp.lt.u32.totalorder %s140_s26, %s199_s1 }
 0x115   :  { %p146_p1 = pnand %p144_p0, %p141_p13 }
 0x117   :  { %149 = shalt.err (!%p146_p1)
}
 0x118   :  { %87 = dma.vmem_to_hbm [thread:$0]  %s82_s22, 256, %s199_s1, [#allocation4], %s155_s16, %s155_s16, %s156_s17  }
 0x119   :  { %152 = dma.done.wait [#allocation4], 256  }
 0x11a   :  { %153 = vsyncadd [#allocation4], 4294967040 }
 0x11b   :  { %91 = vsyncpa [#allocation3], 1 }
 0x11c   :  { %92 = vsyncpa [#allocation4], 1 }

</bundles_post_ra>
